<compile_context>
chip_gen: v7x
topology: tpu7x:2x2x1
jax: 0.10.0
libtpu: 0.0.40
codegen_flags: <defaults>
</compile_context>

<pallas_src>
import functools

import jax
import jax.numpy as jnp
from jax import lax
from jax.experimental import pallas as pl
from jax.experimental.pallas import tpu as pltpu

EPS = 1e-5  # nn.InstanceNorm2d default


def _adain_kernel(x_ref, g_ref, b_ref, o_ref, *, inv_hw):
    # x_ref: (TC, HW_pad)   activations (spatial flattened, zero-padded)
    # g_ref: (TC, 1)        gamma for this (n, channel-tile)
    # b_ref: (TC, 1)        beta  for this (n, channel-tile)
    x = x_ref[...].astype(jnp.float32)

    # One-pass per-channel stats over the spatial axis.  Padding columns are
    # zeros so the sums are exact; the divisor is the true H*W.
    sum_x = jnp.sum(x, axis=-1, keepdims=True)          # (TC, 1)
    sum_x2 = jnp.sum(x * x, axis=-1, keepdims=True)     # (TC, 1)
    mean = sum_x * inv_hw
    var = jnp.maximum(sum_x2 * inv_hw - mean * mean, 0.0)
    inv_std = lax.rsqrt(var + EPS)

    gamma = g_ref[...].astype(jnp.float32)               # (TC, 1)
    beta = b_ref[...].astype(jnp.float32)                # (TC, 1)

    # Fold norm + modulation into a single multiply-add per element.
    scale = (1.0 + gamma) * inv_std                      # (TC, 1)
    shift = beta - mean * scale                          # (TC, 1)
    o_ref[...] = (x * scale + shift).astype(o_ref.dtype)


def _pick_channel_tile(C, HW_pad, itemsize, override=None):
    """Largest channel tile that keeps one x tile around ~4 MiB (so that
    double-buffered in + out stays well inside scoped VMEM on v5e/v6e/v7x),
    rounded to the sublane granule."""
    if override is not None:
        return min(override, C)
    sublane = 16 if itemsize == 2 else (32 if itemsize == 1 else 8)
    budget = 4 << 20  # bytes per x tile
    max_tc = max(1, budget // max(1, HW_pad * itemsize))
    if max_tc >= C:
        return C
    tc = max(sublane, (max_tc // sublane) * sublane)
    return min(tc, C)


def adain_forward(x, s, fc_weight, fc_bias, *, channel_tile=None):
    """x: (N, C, H, W); s: (N, style_dim) or None.
    fc_weight: (2C, style_dim), fc_bias: (2C,)  -- PyTorch nn.Linear layout."""
    N, C, H, W = x.shape
    HW = H * W
    dtype = x.dtype
    x_flat = x.reshape(N, C, HW)

    # Lane-dense spatial axis: pad HW to a multiple of 128 with zeros.
    HW_pad = -(-HW // 128) * 128
    if HW_pad != HW:
        x_flat = jnp.pad(x_flat, ((0, 0), (0, 0), (0, HW_pad - HW)))

    # Style fc hoisted out of the kernel; gamma/beta passed as (N, C, 1).
    if s is not None:
        h = (s.astype(jnp.float32) @ fc_weight.T.astype(jnp.float32)
             + fc_bias.astype(jnp.float32))               # (N, 2C)
        gamma = h[:, :C].reshape(N, C, 1)
        beta = h[:, C:].reshape(N, C, 1)
    else:
        gamma = jnp.zeros((N, C, 1), jnp.float32)
        beta = jnp.zeros((N, C, 1), jnp.float32)

    TC = _pick_channel_tile(C, HW_pad, jnp.dtype(dtype).itemsize, channel_tile)
    grid = (N, pl.cdiv(C, TC))

    kernel = functools.partial(_adain_kernel, inv_hw=1.0 / HW)
    out = pl.pallas_call(
        kernel,
        out_shape=jax.ShapeDtypeStruct((N, C, HW_pad), dtype),
        grid_spec=pltpu.PrefetchScalarGridSpec(
            num_scalar_prefetch=0,
            grid=grid,
            in_specs=[
                pl.BlockSpec((pl.Squeezed(), TC, HW_pad),
                             lambda n, c: (n, c, 0)),        # x
                pl.BlockSpec((pl.Squeezed(), TC, 1),
                             lambda n, c: (n, c, 0)),        # gamma
                pl.BlockSpec((pl.Squeezed(), TC, 1),
                             lambda n, c: (n, c, 0)),        # beta
            ],
            out_specs=pl.BlockSpec((pl.Squeezed(), TC, HW_pad),
                                   lambda n, c: (n, c, 0)),
        ),
        compiler_params=pltpu.CompilerParams(
            dimension_semantics=("parallel", "parallel"),
            vmem_limit_bytes=32 * 1024 * 1024,
        ),
    )(x_flat, gamma, beta)

    if HW_pad != HW:
        out = out[:, :, :HW]
    return out.reshape(N, C, H, W)


def _reference_adain(x, s, fc_weight, fc_bias):
    # Pure-JAX reference mirroring the PyTorch forward.
    N, C, H, W = x.shape
    mean = jnp.mean(x, axis=(2, 3), keepdims=True)
    var = jnp.mean((x - mean) ** 2, axis=(2, 3), keepdims=True)
    xn = (x - mean) / jnp.sqrt(var + EPS)
    if s is None:
        return xn
    h = s @ fc_weight.T + fc_bias                 # (N, 2C)
    gamma = h[:, :C].reshape(N, C, 1, 1)
    beta = h[:, C:].reshape(N, C, 1, 1)
    return (1 + gamma) * xn + beta


if __name__ == "__main__":
    # Small shapes consistent with the module's forward.
    batch = 2
    num_features = 4      # C
    spatial = 16          # H = W  (HW = 256, already a lane multiple)
    style_dim = 32

    key = jax.random.PRNGKey(0)
    kx, ks, kw, kb = jax.random.split(key, 4)

    x = jax.random.normal(kx, (batch, num_features, spatial, spatial),
                          dtype=jnp.float32)
    s = jax.random.normal(ks, (batch, style_dim), dtype=jnp.float32)

    # Deterministic nn.Linear(style_dim, 2*num_features)-style init.
    bound = 1.0 / (style_dim ** 0.5)
    fc_weight = jax.random.uniform(kw, (2 * num_features, style_dim),
                                   minval=-bound, maxval=bound,
                                   dtype=jnp.float32)
    fc_bias = jax.random.uniform(kb, (2 * num_features,),
                                 minval=-bound, maxval=bound,
                                 dtype=jnp.float32)

    out = jax.block_until_ready(adain_forward(x, s, fc_weight, fc_bias))
    ref = _reference_adain(x, s, fc_weight, fc_bias)
    assert out.shape == ref.shape
    assert jnp.allclose(out, ref, atol=1e-4, rtol=1e-4), \
        float(jnp.max(jnp.abs(out - ref)))

    # s=None path (plain instance norm) reuses the same kernel with gamma=beta=0.
    out_none = jax.block_until_ready(adain_forward(x, None, fc_weight, fc_bias))
    ref_none = _reference_adain(x, None, fc_weight, fc_bias)
    assert jnp.allclose(out_none, ref_none, atol=1e-4, rtol=1e-4)

    # Exercise channel tiling + non-128-multiple spatial padding.
    C2, H2 = 16, 10
    kx2, ks2, kw2, kb2 = jax.random.split(jax.random.PRNGKey(1), 4)
    x2 = jax.random.normal(kx2, (batch, C2, H2, H2), dtype=jnp.float32)
    s2 = jax.random.normal(ks2, (batch, style_dim), dtype=jnp.float32)
    w2 = jax.random.uniform(kw2, (2 * C2, style_dim), minval=-bound,
                            maxval=bound, dtype=jnp.float32)
    b2 = jax.random.uniform(kb2, (2 * C2,), minval=-bound, maxval=bound,
                            dtype=jnp.float32)
    out2 = jax.block_until_ready(adain_forward(x2, s2, w2, b2, channel_tile=8))
    ref2 = _reference_adain(x2, s2, w2, b2)
    assert jnp.allclose(out2, ref2, atol=1e-4, rtol=1e-4), \
        float(jnp.max(jnp.abs(out2 - ref2)))

    print("KERNEL_OK")
</pallas_src>

<mosaic_0001>
module attributes {stable_mosaic.version = 11 : i64} {
  func.func @_adain_kernel(%arg0: i32, %arg1: i32, %arg2: memref<1x4x256xf32, #tpu.memory_space<vmem>>, %arg3: memref<1x4x1xf32, #tpu.memory_space<vmem>>, %arg4: memref<1x4x1xf32, #tpu.memory_space<vmem>>, %arg5: memref<1x4x256xf32, #tpu.memory_space<vmem>>) attributes {dimension_semantics = [#tpu.dimension_semantics<parallel>, #tpu.dimension_semantics<parallel>], iteration_bounds = array<i64: 2, 1>, scalar_prefetch = 0 : i64, scratch_operands = 0 : i64, tpu.core_type = #tpu.core_type<tc>, window_params = [{transform_indices = @transform_0, window_bounds = array<i64: 1, 4, 256>}, {transform_indices = @transform_1, window_bounds = array<i64: 1, 4, 1>}, {transform_indices = @transform_2, window_bounds = array<i64: 1, 4, 1>}, {transform_indices = @transform_3, window_bounds = array<i64: 1, 4, 256>}]} {
    %c0 = arith.constant 0 : index
    %c0_0 = arith.constant 0 : index
    %c0_1 = arith.constant 0 : index
    %0 = vector.load %arg2[%c0, %c0_0, %c0_1] : memref<1x4x256xf32, #tpu.memory_space<vmem>>, vector<1x4x256xf32>
    %1 = vector.shape_cast %0 : vector<1x4x256xf32> to vector<4x256xf32>
    %cst = arith.constant dense<0.000000e+00> : vector<4xf32>
    %2 = vector.multi_reduction <add>, %1, %cst [1] : vector<4x256xf32> to vector<4xf32>
    %3 = vector.shape_cast %2 : vector<4xf32> to vector<4x1xf32>
    %4 = arith.mulf %1, %1 : vector<4x256xf32>
    %cst_2 = arith.constant dense<0.000000e+00> : vector<4xf32>
    %5 = vector.multi_reduction <add>, %4, %cst_2 [1] : vector<4x256xf32> to vector<4xf32>
    %6 = vector.shape_cast %5 : vector<4xf32> to vector<4x1xf32>
    %cst_3 = arith.constant 3.906250e-03 : f32
    %7 = vector.broadcast %cst_3 : f32 to vector<4x1xf32>
    %8 = arith.mulf %3, %7 : vector<4x1xf32>
    %cst_4 = arith.constant 3.906250e-03 : f32
    %9 = vector.broadcast %cst_4 : f32 to vector<4x1xf32>
    %10 = arith.mulf %6, %9 : vector<4x1xf32>
    %11 = arith.mulf %8, %8 : vector<4x1xf32>
    %12 = arith.subf %10, %11 : vector<4x1xf32>
    %cst_5 = arith.constant 0.000000e+00 : f32
    %13 = vector.broadcast %cst_5 : f32 to vector<4x1xf32>
    %14 = arith.maximumf %12, %13 : vector<4x1xf32>
    %cst_6 = arith.constant 9.99999974E-6 : f32
    %15 = vector.broadcast %cst_6 : f32 to vector<4x1xf32>
    %16 = arith.addf %14, %15 : vector<4x1xf32>
    %17 = math.rsqrt %16 : vector<4x1xf32>
    %c0_7 = arith.constant 0 : index
    %c0_8 = arith.constant 0 : index
    %c0_9 = arith.constant 0 : index
    %18 = vector.load %arg3[%c0_7, %c0_8, %c0_9] : memref<1x4x1xf32, #tpu.memory_space<vmem>>, vector<1x4x1xf32>
    %19 = vector.shape_cast %18 : vector<1x4x1xf32> to vector<4x1xf32>
    %c0_10 = arith.constant 0 : index
    %c0_11 = arith.constant 0 : index
    %c0_12 = arith.constant 0 : index
    %20 = vector.load %arg4[%c0_10, %c0_11, %c0_12] : memref<1x4x1xf32, #tpu.memory_space<vmem>>, vector<1x4x1xf32>
    %21 = vector.shape_cast %20 : vector<1x4x1xf32> to vector<4x1xf32>
    %cst_13 = arith.constant 1.000000e+00 : f32
    %22 = vector.broadcast %cst_13 : f32 to vector<4x1xf32>
    %23 = arith.addf %22, %19 : vector<4x1xf32>
    %24 = arith.mulf %23, %17 : vector<4x1xf32>
    %25 = arith.mulf %8, %24 : vector<4x1xf32>
    %26 = arith.subf %21, %25 : vector<4x1xf32>
    %27 = vector.broadcast %24 : vector<4x1xf32> to vector<4x256xf32>
    %28 = arith.mulf %1, %27 : vector<4x256xf32>
    %29 = vector.broadcast %26 : vector<4x1xf32> to vector<4x256xf32>
    %30 = arith.addf %28, %29 : vector<4x256xf32>
    %c0_14 = arith.constant 0 : index
    %c0_15 = arith.constant 0 : index
    %c0_16 = arith.constant 0 : index
    %31 = vector.load %arg5[%c0_14, %c0_15, %c0_16] : memref<1x4x256xf32, #tpu.memory_space<vmem>>, vector<1x4x256xf32>
    %32 = vector.shape_cast %31 : vector<1x4x256xf32> to vector<4x256xf32>
    %33 = vector.shape_cast %30 : vector<4x256xf32> to vector<1x4x256xf32>
    tpu.vector_store %arg5[%c0_14, %c0_15, %c0_16], %33 {strides = array<i32>} : memref<1x4x256xf32, #tpu.memory_space<vmem>>, vector<1x4x256xf32>,
    return
  }
  func.func @transform_0(%arg0: i32, %arg1: i32) -> (i32, i32, i32) {
    %c0_i32 = arith.constant 0 : i32
    %c0_i32_0 = arith.constant 0 : i32
    return %arg0, %arg1, %c0_i32 : i32, i32, i32
  }
  func.func @transform_1(%arg0: i32, %arg1: i32) -> (i32, i32, i32) {
    %c0_i32 = arith.constant 0 : i32
    %c0_i32_0 = arith.constant 0 : i32
    return %arg0, %arg1, %c0_i32 : i32, i32, i32
  }
  func.func @transform_2(%arg0: i32, %arg1: i32) -> (i32, i32, i32) {
    %c0_i32 = arith.constant 0 : i32
    %c0_i32_0 = arith.constant 0 : i32
    return %arg0, %arg1, %c0_i32 : i32, i32, i32
  }
  func.func @transform_3(%arg0: i32, %arg1: i32) -> (i32, i32, i32) {
    %c0_i32 = arith.constant 0 : i32
    %c0_i32_0 = arith.constant 0 : i32
    return %arg0, %arg1, %c0_i32 : i32, i32, i32
  }
}

</mosaic_0001>

<bundles_post_ra>
// kernel: tpu_custom_call.1
= control target key start
LH: loop header
LB: loop body
LE: loop exit
PB: predicated region body
PF: predicated region fallthrough
CT: control target
= control target key end

     0   :  { %8 = vsyncpa [#allocation3], 0  ;;  %s742_s0 = inlined_call_operand.vmem [shape: f32[2,4,256], index: 0, kind: input, shape index: {}]   ;;  %s743_s1 = inlined_call_operand.vmem [shape: f32[2,4,1], index: 1, kind: input, shape index: {}]   ;;  %s744_s2 = inlined_call_operand.vmem [shape: f32[2,4,1], index: 2, kind: input, shape index: {}]   ;;  %s745_s3 = inlined_call_operand.hbm [shape: f32[2,4,256], index: 3, kind: output, shape index: {}]  }
   0x1   :  { %10 = vsyncpa [#allocation3 + $0x1], 0  ;;  %s620_s12 = smov 0   ;;  %s622_s13 = smov 0  }
   0x2   :  { %s624_s14 = smov 0   ;;  %s626_s15 = smov 0  }
   0x3   :  { %s628_s16 = smov 0   ;;  %s630_s17 = smov 0  }
   0x4 LB: > { %s438_s18 = sadd.s32 4294967295, %s595_s17   ;;  %s439_s19 = sadd.s32 4294967294, %s595_s17   ;;  %s595_s17 = sphi %s630_s17, %s16_s17   ;;  %s591_s16 = sphi %s628_s16, %s752_s16   ;;  %s587_s15 = sphi %s626_s15, %s751_s15   ;;  %s583_s14 = sphi %s624_s14, %s750_s14   ;;  %s579_s13 = sphi %s622_s13, %s749_s13   ;;  %s575_s12 = sphi %s620_s12, %s748_s12  }
   0x5   : > { %s28_s20 = sadd.s32 1, %s591_s16  ;;  %s121_s21 = sadd.s32 1, %s583_s14 }
   0x6   : > { %p30_p0 = scmp.ge.s32.totalorder %s28_s20, 2  ;;  %p131_p1 = scmp.ne.s32.totalorder %s583_s14, %s579_s13 }
   0x7   : > { %p132_p2 = scmp.eq.s32.totalorder %s438_s18, 1  ;;  %p137_p3 = scmp.ne.s32.totalorder %s579_s13, %s575_s12 }
   0x8   : > { %s754_s20 = smov (%p30_p0, %s28_s20), 0  ;;  %p138_p5 = scmp.eq.s32.totalorder %s439_s19, 1 }
   0x9   : > { %p660_p4 = por %p132_p2, %p131_p1  ;;  %s116_s23 = ssub.s32 %s591_s16, %s754_s20 }
   0xa   : > { %p442_p6 = scmp.ge.s32.totalorder %s595_s17, 1  ;;  %p119_p7 = scmp.eq.s32.totalorder %s116_s23, 0 }
   0xb   : > { %p667_p8 = por %p138_p5, %p137_p3  ;;  %p188_p9 = scmp.lt.s32.totalorder %s595_s17, 3 }
   0xc   : > { %s673_s25 = scalar_select %p119_p7, %s583_s14, %s121_s21  }
   0xd   : > { %p189_p10 = pnand %p442_p6, %p188_p9 }
   0xe   : > { %p230_p11 = scmp.lt.s32.totalorder (!%p189_p10), %s587_s15, 1  ;;  %vm257_vm0 = vcmask (!%p189_p10), 1043456   ;;  %v597_v10 = vmov (!%p189_p10), 0   ;;  %v598_v26 = vmov (!%p189_p10), 839922192   ;;  %v292_v28 = vlaneseq (!%p189_p10)  ;;  %s227_s11 = sand.u32 (!%p189_p10), 1, %s579_s13  }
   0xf   : > { %192 = sbr.rel (%p189_p10) target bundleno = 349 (0x15d), region = 32  ;;  %512 = vset.pattern.permute.xlu1 (!%p189_p10), %v597_v10  ;;  %513 = vset.pattern.permute.xlu0 (!%p189_p10), %v597_v10  ;;  %v290_v27 = vunpack.c.l.s4 (!%p189_p10), %v598_v26  ;;  %s443_s18 = sshll.u32 (!%p189_p10), %s227_s11, 3 }
  0x10   : > { %v293_v30 = vshrl.u32 (!%p189_p10), %v292_v28, 7  ;;  %s454_s19 = sshll.u32 (!%p189_p10), %s587_s15, 7  ;;  %s229_s21 = scalar_lea.vmem (!%p189_p10), [#allocation2], %s443_s18 }
  0x11   : > { %v291_v29 = vunpack.c.0.s8 (!%p189_p10), %v290_v27  ;;  %s329_s23 = sshll.u32 (!%p189_p10), %s229_s21, 4  ;;  %s695_s28 = scalar_lea.hbm (!%p189_p10), %s745_s3, %s454_s19  ;;  %s697_s23 = int_to_ptr.vmem [resolvable:$true] %s329_s23 }
  0x12   : > { %s313_s29 = scalar_lea.sflag (!%p189_p10), [#allocation3], %s227_s11 }
  0x13   : > { %v294_v31 = vsub.s32 (!%p189_p10), %v291_v29, %v293_v30 }
  0x16   : > { %s677_s26 = scalar_select %p230_p11, %s587_s15, 1 }
  0x17   : > { %s599_s15 = smov [#allocation2]  }
  0x18   : > { %s453_s27 = sshll.u32 %s677_s26, 3  ;;  %s446_s4 = sshll.u32 %s677_s26, 2 }
  0x19   : > { %s238_s30 = scalar_lea.vmem %s742_s0, %s453_s27  ;;  %s245_s7 = scalar_lea.vmem %s743_s1, %s446_s4 }
  0x1a   : > { %v253_v0 = vld [vmem:[%s238_s30] sm:$0xff]  ;;  %s252_s10 = scalar_lea.vmem %s744_s2, %s446_s4  ;;  %s517_s30 = scalar_lea.vmem %s697_s23, 128 }
  0x1b   : > { %v255_v1 = vcombine.high %v253_v0, %v253_v0  ;;  %v258_v2 = vsel %vm257_vm0, %v253_v0, 0.0  ;;  %v263_v3 = vmul.f32 %v253_v0, %v253_v0  ;;  %v279_v19 = vld [vmem:[%s245_s7] sm:$0xf]  ;;  %p518_p12 = scmp.ne.s32.totalorder %s697_s23, %s517_s30  ;;  %s521_s4 = sshll.u32 %s599_s15, 4  ;;  %s522_s4 = int_to_ptr.vmem [resolvable:$false] %s521_s4 }
  0x1c   : > { %v281_v20 = vadd.f32 1.0, %v279_v19  ;;  %v280_v23 = vld [vmem:[%s252_s10] sm:$0xf]  ;;  %s523_s5 = scalar_lea.vmem %s522_s4, 256  ;;  %p524_p1 = scmp.lt.s32.totalorder %s697_s23, %s522_s4 }
  0x1d   : > { %v259_v4 = vsel %vm257_vm0, %v255_v1, 0.0  ;;  %v265_v5 = vcombine.high %v263_v3, %v263_v3  ;;  %v267_v6 = vsel %vm257_vm0, %v263_v3, 0.0  ;;  %p519_p13 = pnand %p518_p12, %p660_p4  ;;  %p525_p2 = scmp.lt.s32.totalorder %s523_s5, %s517_s30 }
  0x1e   : > { %v260_v7 = vadd.f32 %v259_v4, %v258_v2 }
  0x1f   : > { %v268_v8 = vsel %vm257_vm0, %v265_v5, 0.0  ;;  %p520_p0 = pneg %p519_p13  ;;  %p526_p3 = por %p525_p2, %p524_p1 }
  0x20   : > { %261 = vadd.xlane.f32.xlu0 %v260_v7  ;;  %v269_v9 = vadd.f32 %v268_v8, %v267_v6 }
  0x21   : > { %p527_p5 = pnand %p526_p3, %p520_p0 }
  0x24   : > { %270 = vadd.xlane.f32.xlu0 %v269_v9 }
  0xad   : > { %v262_v11 = vpop.xlane.xlu0 %261 }
  0xae   : > { %v272_v12 = vmul.f32 0.00390625, %v262_v11 }
  0xb0   : > { %v274_v14 = vmul.f32 %v272_v12, %v272_v12 }
  0xb1   : > { %v271_v13 = vpop.xlane.xlu0 %270 }
  0xb2   : > { %v273_v15 = vmul.f32 0.00390625, %v271_v13 }
  0xb4   : > { %v275_v16 = vsub.f32 %v273_v15, %v274_v14 }
  0xb6   : > { %v276_v17 = vmax.f32 %v275_v16, 0.0 }
  0xb8   : > { %v277_v18 = vadd.f32 1e-05, %v276_v17 }
  0xba   : > { %515 = vrsqrt.f32 %v277_v18 }
  0xc4   : > { %v516_v21 = vpop.eup %515 }
  0xc5   : > { %v282_v22 = vmul.f32 %v516_v21, %v281_v20 }
  0xc7   : > { %287 = vperm.xlu1 %512, %v282_v22   ;;  %v283_v24 = vmul.f32 %v282_v22, %v272_v12 }
  0xc9   : > { %v284_v25 = vsub.f32 %v280_v23, %v283_v24 }
  0xcb   : > { %300 = vperm.xlu1 %512, %v284_v25  }
 0x146   : > { %v288_v32 = vpop.permute.xlu1 %287 }
 0x147   : > { %v295_v33 = vrot.slane %v288_v32, %v294_v31 }
 0x149   : > { %v297_v35 = vmul.f32 %v295_v33, %v253_v0 }
 0x14a   : > { %v301_v34 = vpop.permute.xlu1 %300 }
 0x14b   : > { %v308_v36 = vrot.slane %v301_v34, %v294_v31 }
 0x14d   : > { %v310_v37 = vadd.f32 %v308_v36, %v297_v35 }
 0x14f   : > { %311 = vst [vmem:[%s229_s21] sm:$0xff] %v310_v37 }
 0x150   : > { %530 = shalt.err (!%p527_p5)
}
 0x151   : > { %s531_s6 = scalar_lea.hbm %s695_s28, 128  ;;  %s535_s9 = scalar_lea.hbm %s745_s3, 256 }
 0x152   : > { %p532_p6 = scmp.ne.s32.totalorder %s695_s28, %s531_s6  ;;  %p536_p10 = scmp.lt.u32.totalorder %s695_s28, %s745_s3 }
 0x153   : > { %p537_p11 = scmp.lt.u32.totalorder %s535_s9, %s531_s6  ;;  %p539_p13 = scmp.lt.u32.totalorder %s531_s6, %s695_s28 }
 0x154   : > { %p533_p7 = pnand %p532_p6, %p660_p4 }
 0x155   : > { %p538_p12 = por %p537_p11, %p536_p10 }
 0x156   : > { %p534_p9 = pneg %p533_p7 }
 0x157   : > { %p540_p0 = por %p539_p13, %p538_p12 }
 0x159   : > { %p541_p1 = pnand %p540_p0, %p534_p9 }
 0x15b   : > { %544 = shalt.err (!%p541_p1)
}
 0x15c   : > { %455 = dma.vmem_to_hbm [thread:$0]  (%p660_p4), %s697_s23, 128, %s695_s28, %s313_s29  }
 0x15d PF: > { %p461_p2 = scmp.ge.s32.totalorder %s595_s17, 2  ;;  %s341_s18 = sand.u32 1, %s575_s12  }
 0x15e   : > { %s342_s19 = scalar_lea.sflag [#allocation3], %s341_s18 }
 0x15f   : > { %p458_p3 = pnand %p461_p2, %p667_p8 }
 0x161   : > { %570 = dma.done.wait (!%p458_p3), %s342_s19, 128  }
 0x162   : > { %572 = vsyncadd (!%p458_p3), %s342_s19, 4294967168  ;;  %s16_s17 = sadd.s32 1, %s595_s17   ;;  %s748_s12 = smov %s579_s13 }
 0x163   : > { %p13_p5 = scmp.ge.s32.totalorder %s16_s17, 4   ;;  %s749_s13 = smov %s583_s14 }
 0x164   : > { %s750_s14 = smov %s673_s25  ;;  %s751_s15 = smov %s591_s16 }
 0x165   : > { %s752_s16 = smov %s754_s20  ;;  %15 = sbr.rel (!%p13_p5) target bundleno = 4 (0x4), region = 73 }
 0x16c   :  { %347 = vsyncpa [#allocation3], 1 }
 0x16d   :  { %349 = vsyncpa [#allocation3 + $0x1], 1 }

</bundles_post_ra>
